<compile_context>
chip_gen: v6e
topology: v6e:2x2x1
jax: 0.10.0
libtpu: 0.0.40
codegen_flags: <defaults>
</compile_context>

<pallas_src>
import functools
import math

import jax
import jax.numpy as jnp
from jax import lax
from jax.experimental import pallas as pl
from jax.experimental.pallas import tpu as pltpu


def _round_up(x, m):
    return ((x + m - 1) // m) * m


def _rowsum_kernel(logp_ref, tgt_ref, out_ref, acc_ref, *,
                   padding_idx, tv, pad_tile, pad_chunk, pad_lane):
    """Grid = (num_b_tiles, num_v_tiles); V is the last ('arbitrary') axis.

    Accumulates, per row, sum_j logp[row, j] with the padding column zeroed,
    then (at the last V-tile) zeroes rows whose target == padding_idx and
    folds the tb rows down to an (8, 128) partial block.
    """
    j = pl.program_id(1)
    nv = pl.num_programs(1)

    @pl.when(j == 0)
    def _():
        acc_ref[...] = jnp.zeros_like(acc_ref)

    tb = acc_ref.shape[0]
    n_chunks = tv // 128

    def load_chunk(k):
        chunk = logp_ref[:, k * 128:(k + 1) * 128].astype(jnp.float32)
        if k == pad_chunk:  # static: only one 128-lane chunk ever pays this
            lane = lax.broadcasted_iota(jnp.int32, (tb, 128), 1)
            mask = jnp.logical_and(lane == pad_lane, j == pad_tile)
            chunk = jnp.where(mask, 0.0, chunk)
        return chunk

    part = load_chunk(0)
    for k in range(1, n_chunks):
        part = part + load_chunk(k)
    acc_ref[...] += part

    @pl.when(j == nv - 1)
    def _():
        tgt = tgt_ref[...]                                   # (tb, 1) int32
        acc = jnp.where(tgt != padding_idx, acc_ref[...], 0.0)
        folded = acc[0:8, :]
        for m in range(1, tb // 8):
            folded = folded + acc[m * 8:(m + 1) * 8, :]
        out_ref[...] = folded                                # (8, 128)


def onmt_label_smoothing_loss(output, target, *, size, padding_idx, smoothing,
                              tb=None, tv=None):
    """output: (B, size) float log-probs, target: (B,) int — returns scalar."""
    assert 0.0 < smoothing <= 1.0
    assert size > 2
    b, v = output.shape
    assert v == size

    confidence = 1.0 - smoothing
    smoothing_value = smoothing / (size - 2)
    conf_logconf = confidence * math.log(confidence) if confidence > 0.0 else 0.0
    sv_logsv = smoothing_value * math.log(smoothing_value)
    row_const = conf_logconf + (size - 2) * sv_logsv        # sum_j p_j*log(p_j)

    # Dtype-dependent sublane multiple (8 f32 / 16 bf16 / 32 int8-fp8).
    itemsize = jnp.dtype(output.dtype).itemsize
    row_mult = {4: 8, 2: 16, 1: 32}.get(itemsize, 8)

    if tb is None:
        # >= 2 B-tiles whenever possible so the 'parallel' axis spans both
        # TensorCores on v7x; capped so the block stays modest.
        tb = min(256, _round_up(pl.cdiv(b, 2), row_mult))
        tb = max(tb, row_mult)
    if tv is None:
        tv = min(4096, _round_up(v, 128))   # <=4 MiB f32 block (v7x-safe)
    assert tb % row_mult == 0 and tv % 128 == 0

    b_pad = _round_up(b, tb)
    v_pad = _round_up(v, tv)

    logp = output                                    # keep input dtype (bf16 ok)
    if (b_pad, v_pad) != (b, v):
        # Zero padding adds exactly 0 to the row-sum -> no ragged mask needed.
        logp = jnp.pad(logp, ((0, b_pad - b), (0, v_pad - v)))
    tgt = target.astype(jnp.int32).reshape(b, 1)
    if b_pad != b:
        tgt = jnp.pad(tgt, ((0, b_pad - b), (0, 0)), constant_values=padding_idx)

    nb = b_pad // tb
    nv = v_pad // tv

    kernel = functools.partial(
        _rowsum_kernel,
        padding_idx=int(padding_idx),
        tv=tv,
        pad_tile=int(padding_idx) // tv,
        pad_chunk=(int(padding_idx) % tv) // 128,
        pad_lane=int(padding_idx) % 128,
    )

    partials = pl.pallas_call(
        kernel,
        out_shape=jax.ShapeDtypeStruct((nb * 8, 128), jnp.float32),
        grid=(nb, nv),
        in_specs=[
            pl.BlockSpec((tb, tv), lambda i, j: (i, j)),   # log-prob tile
            pl.BlockSpec((tb, 1), lambda i, j: (i, 0)),    # targets (resident per B-tile)
        ],
        out_specs=pl.BlockSpec((8, 128), lambda i, j: (i, 0)),
        scratch_shapes=[pltpu.VMEM((tb, 128), jnp.float32)],
        compiler_params=pltpu.CompilerParams(
            dimension_semantics=("parallel", "arbitrary"),
            vmem_limit_bytes=32 * 1024 * 1024),
    )(logp, tgt)

    # O(B) corrections outside the kernel.
    tgt_b = target.astype(jnp.int32)
    valid = tgt_b != padding_idx
    logp_t = jnp.take_along_axis(output, tgt_b[:, None], axis=1)[:, 0].astype(jnp.float32)
    row_corr = jnp.where(valid,
                         row_const - (confidence - smoothing_value) * logp_t,
                         0.0)
    return jnp.sum(row_corr) - smoothing_value * jnp.sum(partials)


def _reference(output, target, *, size, padding_idx, smoothing):
    confidence = 1.0 - smoothing
    smoothing_value = smoothing / (size - 2)
    b = output.shape[0]
    one_hot = jnp.full((size,), smoothing_value, jnp.float32).at[padding_idx].set(0.0)
    model_prob = jnp.tile(one_hot[None, :], (b, 1))
    model_prob = model_prob.at[jnp.arange(b), target].set(confidence)
    model_prob = jnp.where((target == padding_idx)[:, None], 0.0, model_prob)
    term = jnp.where(model_prob > 0.0,
                     model_prob * (jnp.log(model_prob) - output), 0.0)
    return jnp.sum(term)


if __name__ == "__main__":
    def run_case(b, size, padding_idx, smoothing, tb, tv, key,
                 dtype=jnp.float32, rtol=1e-4, atol=1e-3):
        k1, k2 = jax.random.split(key)
        logits = jax.random.normal(k1, (b, size), dtype=jnp.float32)
        output = jax.nn.log_softmax(logits, axis=-1).astype(dtype)   # log-probs
        target = jax.random.randint(k2, (b,), 0, size, dtype=jnp.int32)
        target = target.at[b // 2].set(padding_idx)   # include a padded row
        loss = onmt_label_smoothing_loss(
            output, target, size=size, padding_idx=padding_idx,
            smoothing=smoothing, tb=tb, tv=tv)
        loss = jax.block_until_ready(loss)
        ref = _reference(output, target, size=size, padding_idx=padding_idx,
                         smoothing=smoothing)
        assert jnp.allclose(loss, ref, rtol=rtol, atol=atol), (loss, ref)

    key = jax.random.PRNGKey(0)
    k1, k2, k3, k4 = jax.random.split(key, 4)
    # Multi-tile grid: 2 B-tiles x 2 V-tiles, vocab is a lane multiple.
    run_case(16, 512, 3, 0.1, 8, 256, k1)
    # Ragged shapes (B, V not tile multiples) -> exercises the zero padding.
    run_case(10, 300, 0, 0.1, 8, 128, k2)
    # Default tile selection (nb=2 so the parallel axis has 2 tiles).
    run_case(16, 512, 3, 0.1, None, None, k3)
    # bf16 input -> exercises the 16-row sublane multiple and per-chunk upcast.
    run_case(32, 640, 5, 0.1, None, None, k4,
             dtype=jnp.bfloat16, rtol=2e-3, atol=5e-2)

    print("KERNEL_OK")
</pallas_src>

<mosaic_0001>
module attributes {stable_mosaic.version = 11 : i64} {
  func.func @_rowsum_kernel(%arg0: i32, %arg1: i32, %arg2: memref<8x256xf32, #tpu.memory_space<vmem>>, %arg3: memref<8x1xi32, #tpu.memory_space<vmem>>, %arg4: memref<8x128xf32, #tpu.memory_space<vmem>>, %arg5: memref<8x128xf32, #tpu.memory_space<vmem>>) attributes {dimension_semantics = [#tpu.dimension_semantics<parallel>, #tpu.dimension_semantics<arbitrary>], iteration_bounds = array<i64: 2, 2>, scalar_prefetch = 0 : i64, scratch_operands = 1 : i64, tpu.core_type = #tpu.core_type<tc>, window_params = [{transform_indices = @transform_0, window_bounds = array<i64: 8, 256>}, {transform_indices = @transform_1, window_bounds = array<i64: 8, 1>}, {transform_indices = @transform_2, window_bounds = array<i64: 8, 128>}]} {
    %c0_i32 = arith.constant 0 : i32
    %0 = arith.cmpi eq, %arg1, %c0_i32 : i32
    %1 = arith.extui %0 : i1 to i32
    %c0_i32_0 = arith.constant 0 : i32
    %2 = arith.cmpi ne, %1, %c0_i32_0 : i32
    scf.if %2 {
      %cst_9 = arith.constant 0.000000e+00 : f32
      %20 = vector.broadcast %cst_9 : f32 to vector<8x128xf32>
      %c0_10 = arith.constant 0 : index
      %c0_11 = arith.constant 0 : index
      %21 = vector.load %arg5[%c0_10, %c0_11] : memref<8x128xf32, #tpu.memory_space<vmem>>, vector<8x128xf32>
      tpu.vector_store %arg5[%c0_10, %c0_11], %20 {strides = array<i32>} : memref<8x128xf32, #tpu.memory_space<vmem>>, vector<8x128xf32>,
    } else {
    }
    %c0 = arith.constant 0 : index
    %c0_1 = arith.constant 0 : index
    %3 = vector.load %arg2[%c0, %c0_1] : memref<8x256xf32, #tpu.memory_space<vmem>>, vector<8x128xf32>
    %4 = tpu.iota {dimensions = array<i32: 1>} : vector<8x128xi32>
    %c3_i32 = arith.constant 3 : i32
    %5 = vector.broadcast %c3_i32 : i32 to vector<8x128xi32>
    %6 = arith.cmpi eq, %4, %5 : vector<8x128xi32>
    %c0_i32_2 = arith.constant 0 : i32
    %7 = arith.cmpi eq, %arg1, %c0_i32_2 : i32
    %8 = vector.broadcast %7 : i1 to vector<8x128xi1>
    %9 = arith.andi %6, %8 : vector<8x128xi1>
    %cst = arith.constant 0.000000e+00 : f32
    %10 = vector.broadcast %cst : f32 to vector<8x128xf32>
    %11 = arith.select %9, %10, %3 : vector<8x128xi1>, vector<8x128xf32>
    %c0_3 = arith.constant 0 : index
    %c128 = arith.constant 128 : index
    %12 = vector.load %arg2[%c0_3, %c128] : memref<8x256xf32, #tpu.memory_space<vmem>>, vector<8x128xf32>
    %13 = arith.addf %11, %12 : vector<8x128xf32>
    %c0_4 = arith.constant 0 : index
    %c0_5 = arith.constant 0 : index
    %14 = vector.load %arg5[%c0_4, %c0_5] : memref<8x128xf32, #tpu.memory_space<vmem>>, vector<8x128xf32>
    %15 = arith.addf %14, %13 : vector<8x128xf32>
    %c0_6 = arith.constant 0 : index
    %c0_7 = arith.constant 0 : index
    %16 = vector.load %arg5[%c0_6, %c0_7] : memref<8x128xf32, #tpu.memory_space<vmem>>, vector<8x128xf32>
    tpu.vector_store %arg5[%c0_6, %c0_7], %15 {strides = array<i32>} : memref<8x128xf32, #tpu.memory_space<vmem>>, vector<8x128xf32>,
    %c1_i32 = arith.constant 1 : i32
    %17 = arith.cmpi eq, %arg1, %c1_i32 : i32
    %18 = arith.extui %17 : i1 to i32
    %c0_i32_8 = arith.constant 0 : i32
    %19 = arith.cmpi ne, %18, %c0_i32_8 : i32
    scf.if %19 {
      %c0_9 = arith.constant 0 : index
      %c0_10 = arith.constant 0 : index
      %20 = vector.load %arg3[%c0_9, %c0_10] : memref<8x1xi32, #tpu.memory_space<vmem>>, vector<8x1xi32>
      %c3_i32_11 = arith.constant 3 : i32
      %21 = vector.broadcast %c3_i32_11 : i32 to vector<8x1xi32>
      %22 = arith.cmpi ne, %20, %21 : vector<8x1xi32>
      %c0_12 = arith.constant 0 : index
      %c0_13 = arith.constant 0 : index
      %23 = vector.load %arg5[%c0_12, %c0_13] : memref<8x128xf32, #tpu.memory_space<vmem>>, vector<8x128xf32>
      %cst_14 = arith.constant 0.000000e+00 : f32
      %24 = vector.shape_cast %22 : vector<8x1xi1> to vector<8x1xi1>
      %25 = vector.broadcast %24 : vector<8x1xi1> to vector<8x128xi1>
      %26 = vector.broadcast %cst_14 : f32 to vector<8x128xf32>
      %27 = arith.select %25, %23, %26 : vector<8x128xi1>, vector<8x128xf32>
      %c0_15 = arith.constant 0 : index
      %c0_16 = arith.constant 0 : index
      %28 = vector.load %arg4[%c0_15, %c0_16] : memref<8x128xf32, #tpu.memory_space<vmem>>, vector<8x128xf32>
      tpu.vector_store %arg4[%c0_15, %c0_16], %27 {strides = array<i32>} : memref<8x128xf32, #tpu.memory_space<vmem>>, vector<8x128xf32>,
    } else {
    }
    return
  }
  func.func @transform_0(%arg0: i32, %arg1: i32) -> (i32, i32) {
    %c0_i32 = arith.constant 0 : i32
    return %arg0, %arg1 : i32, i32
  }
  func.func @transform_1(%arg0: i32, %arg1: i32) -> (i32, i32) {
    %c0_i32 = arith.constant 0 : i32
    %c0_i32_0 = arith.constant 0 : i32
    return %arg0, %c0_i32 : i32, i32
  }
  func.func @transform_2(%arg0: i32, %arg1: i32) -> (i32, i32) {
    %c0_i32 = arith.constant 0 : i32
    %c0_i32_0 = arith.constant 0 : i32
    return %arg0, %c0_i32 : i32, i32
  }
}

</mosaic_0001>

<bundles_post_ra>
// kernel: tpu_custom_call.1
= control target key start
LH: loop header
LB: loop body
LE: loop exit
PB: predicated region body
PF: predicated region fallthrough
CT: control target
= control target key end

     0   :  { %7 = vsyncpa [#allocation4], 0  ;;  %s828_s0 = inlined_call_operand.hbm [shape: f32[16,512], index: 0, kind: input, shape index: {}]   ;;  %s829_s1 = inlined_call_operand.vmem [shape: s32[16,1], index: 1, kind: input, shape index: {}]   ;;  %s830_s2 = inlined_call_operand.hbm [shape: f32[16,128], index: 2, kind: output, shape index: {}]  }
   0x1   :  { %9 = vsyncpa [#allocation4 + $0x1], 0 }
   0x2   :  { %10 = vsyncpa [#allocation5], 0 }
   0x3   :  { %12 = vsyncpa [#allocation5 + $0x1], 0  ;;  %s629_s9 = smov 0   ;;  %s631_s10 = smov 0  }
   0x4   :  { %s633_s11 = smov 0   ;;  %s635_s12 = smov 0  }
   0x5   :  { %s637_s13 = smov 0   ;;  %s639_s14 = smov 0  }
   0x6   :  { %s641_s15 = smov 0   ;;  %s643_s16 = smov 0  }
   0x7   :  { %s645_s17 = smov 0   ;;  %s647_s18 = smov 0  }
   0x8   :  { %s649_s19 = smov 0  }
   0x9 LB: > { %s337_s20 = sadd.s32 4294967295, %s608_s19   ;;  %s338_s21 = sadd.s32 4294967294, %s608_s19   ;;  %s608_s19 = sphi %s649_s19, %s18_s19   ;;  %s604_s18 = sphi %s647_s18, %s854_s18   ;;  %s600_s17 = sphi %s645_s17, %s853_s17   ;;  %s596_s16 = sphi %s643_s16, %s852_s16   ;;  %s592_s15 = sphi %s641_s15, %s851_s15   ;;  %s588_s14 = sphi %s639_s14, %s850_s14   ;;  %s584_s13 = sphi %s637_s13, %s849_s13   ;;  %s580_s12 = sphi %s635_s12, %s848_s12   ;;  %s576_s11 = sphi %s633_s11, %s847_s11   ;;  %s572_s10 = sphi %s631_s10, %s846_s10   ;;  %s568_s9 = sphi %s629_s9, %s845_s9  }
   0xa   : > { %s27_s22 = sadd.s32 1, %s600_s17  ;;  %s30_s23 = sadd.s32 1, %s604_s18 }
   0xb   : > { %p28_p0 = scmp.ge.s32.totalorder %s27_s22, 2  ;;  %s39_s24 = sadd.s32 1, %s588_s14 }
   0xc   : > { %p46_p1 = scmp.ne.s32.totalorder %s588_s14, %s584_s13  ;;  %p47_p2 = scmp.eq.s32.totalorder %s608_s19, 0 }
   0xd   : > { %s856_s22 = smov (%p28_p0, %s27_s22), 0  ;;  %s858_s23 = smov (!%p28_p0, %s30_s23), %s604_s18 }
   0xe   : > { %833 = sst [smem:[#allocation9_spill]] %s856_s22  ;;  %s35_s25 = ssub.s32 %s600_s17, %s856_s22 }
   0xf   : > { %p695_p3 = por %p47_p2, %p46_p1  ;;  %p32_p4 = scmp.ge.s32.totalorder %s858_s23, 2 }
  0x10   : > { %p52_p5 = scmp.ne.s32.totalorder %s584_s13, %s580_s12  ;;  %p53_p6 = scmp.eq.s32.totalorder %s337_s20, 0 }
  0x11   : > { %s91_s27 = sadd.s32 1, %s576_s11  ;;  %s860_s23 = smov (%p32_p4, %s858_s23), 0 }
  0x12   : > { %835 = sst [smem:[#allocation10_spill]] %s860_s23  ;;  %p703_p7 = por %p53_p6, %p52_p5 }
  0x13   : > { %p101_p8 = scmp.ne.s32.totalorder %s576_s11, %s572_s10  ;;  %s34_s29 = ssub.s32 %s604_s18, %s860_s23 }
  0x14   : > { %p102_p9 = scmp.eq.s32.totalorder %s337_s20, 3  ;;  %s36_s30 = sor.u32 %s35_s25, %s34_s29 }
  0x15   : > { %p89_p10 = scmp.eq.s32.totalorder %s34_s29, 0  ;;  %p37_p11 = scmp.eq.s32.totalorder %s36_s30, 0 }
  0x16   : > { %p711_p12 = por %p102_p9, %p101_p8  ;;  %p107_p13 = scmp.ne.s32.totalorder %s572_s10, %s568_s9 }
  0x17   : > { %s716_s4 = scalar_select %p89_p10, %s576_s11, %s91_s27  }
  0x18   : > { %s719_s5 = scalar_select %p37_p11, %s588_s14, %s39_s24  }
  0x19   : > { %p108_p0 = scmp.eq.s32.totalorder %s338_s21, 3  ;;  %p367_p1 = scmp.lt.s32.totalorder %s608_s19, 4 }
  0x1a   : > { %838 = sst [smem:[#allocation11_spill]] %s719_s5  ;;  %s128_s7 = sand.u32 1, %s588_s14  }
  0x1b   : > { %p724_p2 = por %p108_p0, %p107_p13  ;;  %s341_s8 = sshll.u32 %s128_s7, 4 }
  0x1c   : > { %s342_s12 = sshll.u32 %s600_s17, 1  ;;  %s343_s20 = sshll.u32 %s604_s18, 2 }
  0x1d   : > { %s839_s6 = scalar_select %p724_p2, 1, 0 }
  0x1e   : > { %s132_s25 = scalar_lea.vmem [#allocation3], %s341_s8  ;;  %s138_s30 = sadd.s32 %s343_s20, %s342_s12 }
  0x1f   : > { %s142_s29 = sshll.u32 %s132_s25, 4  ;;  %s344_s27 = sshll.u32 %s138_s30, 7  ;;  %s143_s29 = int_to_ptr.vmem [resolvable:$true] %s142_s29 }
  0x20   : > { %p733_p4 = pnand %p367_p1, %p695_p3  ;;  %s140_s22 = scalar_lea.hbm %s828_s0, %s344_s27 }
  0x21   : > { %p345_p5 = scmp.ge.s32.totalorder %s608_s19, 1  ;;  %p154_p6 = scmp.lt.s32.totalorder %s608_s19, 5 }
  0x22   : > { %s129_s5 = scalar_lea.sflag [#allocation4], %s128_s7  ;;  %p462_p8 = pneg %p733_p4 }
  0x23   : > { %s473_s8 = scalar_lea.vmem %s143_s29, 256  ;;  %s610_s12 = smov [#allocation3]  }
  0x24   : > { %p474_p9 = scmp.ne.s32.totalorder %s143_s29, %s473_s8  ;;  %s478_s26 = sshll.u32 %s610_s12, 4  ;;  %s479_s26 = int_to_ptr.vmem [resolvable:$false] %s478_s26 }
  0x25   : > { %s480_s20 = scalar_lea.vmem %s479_s26, 512  ;;  %p481_p3 = scmp.lt.s32.totalorder %s143_s29, %s479_s26 }
  0x26   : > { %p476_p10 = pnand %p474_p9, %p462_p8  ;;  %p482_p13 = scmp.lt.s32.totalorder %s480_s20, %s473_s8 }
  0x28   : > { %p477_p11 = pneg %p476_p10  ;;  %p483_p0 = por %p482_p13, %p481_p3 }
  0x2a   : > { %p484_p1 = pnand %p483_p0, %p477_p11 }
  0x2c   : > { %487 = shalt.err (!%p484_p1)
}
  0x2d   : > { %362 = dma.hbm_to_vmem [thread:$0]  (!%p733_p4), %s140_s22, 256, %s143_s29, %s129_s5  }
  0x2e   : > { %p155_p2 = pnand %p345_p5, %p154_p6 }
  0x2f   : > { %s160_s23 = sand.u32 (!%p155_p2), 1, %s584_s13  }
  0x30   : > { %158 = sbr.rel (%p155_p2) target bundleno = 231 (0xe7), region = 28  ;;  %s346_s7 = sshll.u32 (!%p155_p2), %s160_s23, 4 }
  0x31   : > { %s161_s25 = scalar_lea.sflag (!%p155_p2), [#allocation4], %s160_s23  ;;  %s164_s30 = scalar_lea.vmem (!%p155_p2), [#allocation3], %s346_s7 }
  0x35   : > { %559 = dma.done.wait (%p703_p7), %s161_s25, 256  }
  0x36   : > { %561 = vsyncadd (%p703_p7), %s161_s25, 4294967040  ;;  %s186_s22 = sand.u32 1, %s572_s10   ;;  %p190_p4 = scmp.lt.s32.totalorder %s596_s16, 1 }
  0x37   : > { %s759_s5 = sshll.u32 %s186_s22, 3  ;;  %p194_p2 = scmp.eq.s32.totalorder %s592_s15, 0 }
  0x38   : > { %s191_s29 = scalar_select %p190_p4, %s596_s16, 1 }
  0x39   : > { %s188_s28 = scalar_lea.vmem [#allocation6], %s759_s5  ;;  %p349_p7 = scmp.ne.s32.totalorder %s592_s15, 0 }
  0x3a   : > { %s348_s27 = sshll.u32 %s191_s29, 3 }
  0x3b   : > { %s193_s8 = scalar_lea.vmem %s829_s1, %s348_s27  ;;  %197 = sbr.rel (%p349_p7) target bundleno = 66 (0x42), region = 36 }
  0x40   : > { %v611_v0 = vmov 0.0  }
  0x41   : > { %198 = vst [vmem:[#allocation2] sm:$0xff] %v611_v0 }
  0x42 PF: > { %v200_v1 = vlaneseq  ;;  %s203_s12 = scalar_select %p194_p2, 1, 0  ;;  %v199_v4 = vld [vmem:[%s164_s30] sm:$0xff]  ;;  %v208_v5 = vld [vmem:[%s164_s30 + $0x8] sm:$0xff] }
  0x43   : > { %p350_p5 = scmp.ne.s32.totalorder %s592_s15, 1 }
  0x44   : > { %v201_v2 = vand.u32 127, %v200_v1  ;;  %v204_v3 = vstv %s203_s12 }
  0x45   : > { %vm205_vm0 = vcmp.eq.s32.totalorder %v204_v3, 1 }
  0x46   : > { %vm202_vm1 = vcmp.eq.s32.totalorder %v201_v2, 3 }
  0x47   : > { %vm206_vm2 = vmand %vm202_vm1, %vm205_vm0 }
  0x48   : > { %v207_v6 = vsel %vm206_vm2, 0.0, %v199_v4  ;;  %v210_v7 = vld [vmem:[#allocation2] sm:$0xff] }
  0x49   : > { %v209_v8 = vadd.f32 %v208_v5, %v207_v6  ;;  %216 = sbr.rel (%p350_p5) target bundleno = 208 (0xd0), region = 40 }
  0x4b   : > { %v211_v9 = vadd.f32 %v210_v7, %v209_v8 }
  0x4d   : > { %212 = vst [vmem:[#allocation2] sm:$0xff] %v211_v9 }
  0x4e   : > { %v217_v10 = vld [vmem:[%s193_s8] sm:$0xff]  ;;  %v612_v11 = vmov 0  }
  0x4f   : > { %459 = vset.pattern.permute.xlu0 %v612_v11  ;;  %vm218_vm3 = vcmp.ne.s32.totalorder %v217_v10, 3 }
  0x50   : > { %v220_v12 = vsel %vm218_vm3, 1, %v612_v11 }
  0x51   : > { %222 = vperm.xlu0 %459, %v220_v12  }
  0x54   : > { %v219_v13 = vld [vmem:[#allocation2] sm:$0xff] }
  0xcc   : > { %v223_v14 = vpop.permute.xlu0 %222 }
  0xcd   : > { %vm224_vm4 = vcmp.eq.s32.totalorder %v223_v14, 1 }
  0xce   : > { %v225_v15 = vsel %vm224_vm4, %v219_v13, 0.0 }
  0xcf   : > { %226 = vst [vmem:[%s188_s28] sm:$0xff] %v225_v15 }
  0xd0 PF: > { %s352_s15 = sshll.u32 %s596_s16, 7  ;;  %s241_s7 = sshll.u32 %s188_s28, 4  ;;  %s242_s7 = int_to_ptr.vmem [resolvable:$true] %s241_s7 }
  0xd1   : > { %s239_s23 = scalar_lea.hbm %s830_s2, %s352_s15  ;;  %s228_s25 = scalar_lea.sflag [#allocation5], %s186_s22 }
  0xd2   : > { %s488_s30 = scalar_lea.vmem %s242_s7, 128  ;;  %s613_s29 = smov [#allocation6]  }
  0xd3   : > { %p489_p6 = scmp.ne.s32.totalorder %s242_s7, %s488_s30  ;;  %s492_s27 = sshll.u32 %s613_s29, 4  ;;  %s493_s27 = int_to_ptr.vmem [resolvable:$false] %s492_s27 }
  0xd4   : > { %s494_s24 = scalar_lea.vmem %s493_s27, 256  ;;  %p495_p10 = scmp.lt.s32.totalorder %s242_s7, %s493_s27 }
  0xd5   : > { %p490_p8 = pnand %p489_p6, %p711_p12  ;;  %p496_p11 = scmp.lt.s32.totalorder %s494_s24, %s488_s30 }
  0xd7   : > { %p491_p9 = pneg %p490_p8  ;;  %p497_p3 = por %p496_p11, %p495_p10 }
  0xd9   : > { %p498_p13 = pnand %p497_p3, %p491_p9 }
  0xdb   : > { %501 = shalt.err (!%p498_p13)
}
  0xdc   : > { %s502_s16 = scalar_lea.hbm %s239_s23, 128  ;;  %s506_s21 = scalar_lea.hbm %s830_s2, 256 }
  0xdd   : > { %p503_p0 = scmp.ne.s32.totalorder %s239_s23, %s502_s16  ;;  %p507_p2 = scmp.lt.s32.totalorder %s239_s23, %s830_s2 }
  0xde   : > { %p508_p7 = scmp.lt.s32.totalorder %s506_s21, %s502_s16 }
  0xdf   : > { %p504_p1 = pnand %p503_p0, %p711_p12 }
  0xe0   : > { %p509_p5 = por %p508_p7, %p507_p2 }
  0xe1   : > { %p505_p4 = pneg %p504_p1 }
  0xe3   : > { %p510_p6 = pnand %p509_p5, %p505_p4 }
  0xe5   : > { %513 = shalt.err (!%p510_p6)
}
  0xe6   : > { %357 = dma.vmem_to_hbm [thread:$0]  (%p711_p12), %s242_s7, 128, %s239_s23, %s228_s25  }
  0xe7 PF: > { %p368_p8 = scmp.ge.s32.totalorder %s608_s19, 2  ;;  %s253_s12 = sand.u32 1, %s568_s9  }
  0xe8   : > { %p841_p9 = scmp.ne.s32.totalorder %s839_s6, 0  ;;  %s254_s15 = scalar_lea.sflag [#allocation5], %s253_s12 }
  0xea   : > { %p364_p10 = pnand %p368_p8, %p841_p9 }
  0xec   : > { %p365_p11 = pneg %p364_p10 }
  0xee   : > { %563 = dma.done.wait (%p365_p11), %s254_s15, 128  }
  0xef   : > { %565 = vsyncadd (%p365_p11), %s254_s15, 4294967168  ;;  %s18_s19 = sadd.s32 1, %s608_s19   ;;  %s842_s3 = sld [smem:[#allocation11_spill]] }
  0xf0   : > { %p15_p3 = scmp.ge.s32.totalorder %s18_s19, 6   ;;  %s843_s26 = sld [smem:[#allocation9_spill]] }
  0xf1   : > { %s844_s20 = sld [smem:[#allocation10_spill]]  ;;  %s845_s9 = smov %s572_s10 }
  0xf2   : > { %s846_s10 = smov %s576_s11  ;;  %s847_s11 = smov %s716_s4 }
  0xf3   : > { %s848_s12 = smov %s584_s13  ;;  %s849_s13 = smov %s588_s14 }
  0xf4   : > { %s851_s15 = smov %s600_s17  ;;  %s852_s16 = smov %s604_s18 }
  0xf5   : > { %s850_s14 = smov %s842_s3  ;;  %17 = sbr.rel (!%p15_p3) target bundleno = 9 (0x9), region = 84 }
  0xf6   : > { %s853_s17 = smov %s843_s26 }
  0xf7   : > { %s854_s18 = smov %s844_s20 }
  0xfa   :  { %259 = vsyncpa [#allocation4], 1 }
  0xfb   :  { %261 = vsyncpa [#allocation4 + $0x1], 1 }
  0xfc   :  { %262 = vsyncpa [#allocation5], 1 }
  0xfd   :  { %264 = vsyncpa [#allocation5 + $0x1], 1 }

</bundles_post_ra>
